<compile_context>
chip_gen: v6e
topology: v6e:2x2x1
jax: 0.10.0
libtpu: 0.0.40
codegen_flags: <defaults>
</compile_context>

<pallas_src>
import jax
import jax.numpy as jnp
from jax.experimental import pallas as pl
from jax.experimental.pallas import tpu as pltpu


def mlp_kernel(x_ref, w1_ref, b1_ref, w2_ref, b2_ref, w3_ref, b3_ref,
               w4_ref, b4_ref, o_ref):
    # All four layers fused; per-step activations + all weights fit easily in VMEM.
    h = jnp.dot(x_ref[...], w1_ref[...], preferred_element_type=jnp.float32) + b1_ref[...]
    h = jnp.maximum(h, 0.0)

    h = jnp.dot(h, w2_ref[...], preferred_element_type=jnp.float32) + b2_ref[...]
    h = jnp.maximum(h, 0.0)

    h = jnp.dot(h, w3_ref[...], preferred_element_type=jnp.float32) + b3_ref[...]
    h = jnp.maximum(h, 0.0)

    out = jnp.dot(h, w4_ref[...], preferred_element_type=jnp.float32) + b4_ref[...]
    o_ref[...] = out.astype(o_ref.dtype)


def mlp_forward(x, params):
    """x: (B, 7) float32. params: [(w,b)] with w (in_f, out_f), b (1, out_f)."""
    (w1, b1), (w2, b2), (w3, b3), (w4, b4) = params
    B, in_dim = x.shape
    out_dim = w4.shape[1]  # 2

    # --- Lane/sublane friendly padding (done once in the wrapper) ---
    IN_PAD = 8      # pad feature dim 7 -> 8 (unmasked loads; MXU pads K anyway)
    OUT_PAD = 128   # pad output dim 2 -> 128 (lane-dense stores)

    # Batch tile: multiple of 8, capped at 256 (plenty for this tiny net, fits
    # v7x's smaller 64 MiB VMEM with huge headroom).
    TM = min(256, ((B + 7) // 8) * 8)
    Bp = pl.cdiv(B, TM) * TM  # pad batch to a multiple of TM

    x_p = jnp.zeros((Bp, IN_PAD), jnp.float32).at[:B, :in_dim].set(x)
    w1_p = jnp.zeros((IN_PAD, w1.shape[1]), jnp.float32).at[:in_dim, :].set(w1)
    w4_p = jnp.zeros((w4.shape[0], OUT_PAD), jnp.float32).at[:, :out_dim].set(w4)
    b4_p = jnp.zeros((1, OUT_PAD), jnp.float32).at[:, :out_dim].set(b4)

    const = lambda a: pl.BlockSpec(a.shape, lambda i: (0,) * a.ndim)  # VMEM-resident weights

    out_padded = pl.pallas_call(
        mlp_kernel,
        out_shape=jax.ShapeDtypeStruct((Bp, OUT_PAD), jnp.float32),
        grid=(Bp // TM,),
        in_specs=[
            pl.BlockSpec((TM, IN_PAD), lambda i: (i, 0)),   # x: tiled over batch
            const(w1_p), const(b1),
            const(w2), const(b2),
            const(w3), const(b3),
            const(w4_p), const(b4_p),
        ],
        out_specs=pl.BlockSpec((TM, OUT_PAD), lambda i: (i, 0)),
        compiler_params=pltpu.CompilerParams(
            dimension_semantics=("parallel",),  # megacore sharding on v7x; harmless elsewhere
        ),
    )(x_p, w1_p, b1, w2, b2, w3, b3, w4_p, b4_p)

    return out_padded[:B, :out_dim]


def init_linear(key, in_f, out_f):
    # Deterministic init mimicking torch.nn.Linear (uniform +/- 1/sqrt(fan_in)).
    kw, kb = jax.random.split(key)
    bound = 1.0 / jnp.sqrt(jnp.float32(in_f))
    # Stored as (in_f, out_f) so the kernel does x @ W (transpose of PyTorch layout).
    w = jax.random.uniform(kw, (in_f, out_f), jnp.float32, -bound, bound)
    b = jax.random.uniform(kb, (1, out_f), jnp.float32, -bound, bound)
    return w, b


def reference_forward(x, params):
    h = x
    for i, (w, b) in enumerate(params):
        h = h @ w + b
        if i < len(params) - 1:
            h = jnp.maximum(h, 0.0)
    return h


if __name__ == "__main__":
    key = jax.random.PRNGKey(0)
    k_x, k1, k2, k3, k4 = jax.random.split(key, 5)

    batch = 64
    x = jax.random.normal(k_x, (batch, 7), jnp.float32)

    params = [
        init_linear(k1, 7, 128),
        init_linear(k2, 128, 128),
        init_linear(k3, 128, 64),
        init_linear(k4, 64, 2),
    ]

    out = mlp_forward(x, params)
    out = jax.block_until_ready(out)

    ref = reference_forward(x, params)
    assert out.shape == (batch, 2), out.shape
    assert jnp.allclose(out, ref, atol=1e-4, rtol=1e-4), "mismatch vs reference"

    print("KERNEL_OK")
</pallas_src>

<mosaic_0001>
module attributes {stable_mosaic.version = 11 : i64} {
  func.func @mlp_kernel(%arg0: i32, %arg1: memref<64x8xf32, #tpu.memory_space<vmem>>, %arg2: memref<8x128xf32, #tpu.memory_space<vmem>>, %arg3: memref<1x128xf32, #tpu.memory_space<vmem>>, %arg4: memref<128x128xf32, #tpu.memory_space<vmem>>, %arg5: memref<1x128xf32, #tpu.memory_space<vmem>>, %arg6: memref<128x64xf32, #tpu.memory_space<vmem>>, %arg7: memref<1x64xf32, #tpu.memory_space<vmem>>, %arg8: memref<64x128xf32, #tpu.memory_space<vmem>>, %arg9: memref<1x128xf32, #tpu.memory_space<vmem>>, %arg10: memref<64x128xf32, #tpu.memory_space<vmem>>) attributes {dimension_semantics = [#tpu.dimension_semantics<parallel>], iteration_bounds = array<i64: 1>, scalar_prefetch = 0 : i64, scratch_operands = 0 : i64, tpu.core_type = #tpu.core_type<tc>, window_params = [{transform_indices = @transform_0, window_bounds = array<i64: 64, 8>}, {pipeline_mode = #tpu.pipeline_mode<synchronous>, transform_indices = @transform_1, window_bounds = array<i64: 8, 128>}, {pipeline_mode = #tpu.pipeline_mode<synchronous>, transform_indices = @transform_2, window_bounds = array<i64: 1, 128>}, {pipeline_mode = #tpu.pipeline_mode<synchronous>, transform_indices = @transform_3, window_bounds = array<i64: 128, 128>}, {pipeline_mode = #tpu.pipeline_mode<synchronous>, transform_indices = @transform_4, window_bounds = array<i64: 1, 128>}, {pipeline_mode = #tpu.pipeline_mode<synchronous>, transform_indices = @transform_5, window_bounds = array<i64: 128, 64>}, {pipeline_mode = #tpu.pipeline_mode<synchronous>, transform_indices = @transform_6, window_bounds = array<i64: 1, 64>}, {pipeline_mode = #tpu.pipeline_mode<synchronous>, transform_indices = @transform_7, window_bounds = array<i64: 64, 128>}, {pipeline_mode = #tpu.pipeline_mode<synchronous>, transform_indices = @transform_8, window_bounds = array<i64: 1, 128>}, {transform_indices = @transform_9, window_bounds = array<i64: 64, 128>}]} {
    %c0 = arith.constant 0 : index
    %c0_0 = arith.constant 0 : index
    %0 = vector.load %arg1[%c0, %c0_0] : memref<64x8xf32, #tpu.memory_space<vmem>>, vector<64x8xf32>
    %c0_1 = arith.constant 0 : index
    %c0_2 = arith.constant 0 : index
    %1 = vector.load %arg2[%c0_1, %c0_2] : memref<8x128xf32, #tpu.memory_space<vmem>>, vector<8x128xf32>
    %cst = arith.constant dense<0.000000e+00> : vector<64x128xf32>
    %2 = tpu.matmul %0, %1, %cst {dimension_numbers = #tpu.dot_dimension_numbers<[1], [0], [0], [1], [0, 0, 1, 1], [], []>} : vector<64x8xf32>, vector<8x128xf32>, vector<64x128xf32> -> vector<64x128xf32>
    %c0_3 = arith.constant 0 : index
    %c0_4 = arith.constant 0 : index
    %3 = vector.load %arg3[%c0_3, %c0_4] : memref<1x128xf32, #tpu.memory_space<vmem>>, vector<1x128xf32>
    %4 = vector.broadcast %3 : vector<1x128xf32> to vector<64x128xf32>
    %5 = arith.addf %2, %4 : vector<64x128xf32>
    %cst_5 = arith.constant 0.000000e+00 : f32
    %6 = vector.broadcast %cst_5 : f32 to vector<64x128xf32>
    %7 = arith.maximumf %5, %6 : vector<64x128xf32>
    %c0_6 = arith.constant 0 : index
    %c0_7 = arith.constant 0 : index
    %8 = vector.load %arg4[%c0_6, %c0_7] : memref<128x128xf32, #tpu.memory_space<vmem>>, vector<128x128xf32>
    %cst_8 = arith.constant dense<0.000000e+00> : vector<64x128xf32>
    %9 = tpu.matmul %7, %8, %cst_8 {dimension_numbers = #tpu.dot_dimension_numbers<[1], [0], [0], [1], [0, 0, 1, 1], [], []>} : vector<64x128xf32>, vector<128x128xf32>, vector<64x128xf32> -> vector<64x128xf32>
    %c0_9 = arith.constant 0 : index
    %c0_10 = arith.constant 0 : index
    %10 = vector.load %arg5[%c0_9, %c0_10] : memref<1x128xf32, #tpu.memory_space<vmem>>, vector<1x128xf32>
    %11 = vector.broadcast %10 : vector<1x128xf32> to vector<64x128xf32>
    %12 = arith.addf %9, %11 : vector<64x128xf32>
    %cst_11 = arith.constant 0.000000e+00 : f32
    %13 = vector.broadcast %cst_11 : f32 to vector<64x128xf32>
    %14 = arith.maximumf %12, %13 : vector<64x128xf32>
    %c0_12 = arith.constant 0 : index
    %c0_13 = arith.constant 0 : index
    %15 = vector.load %arg6[%c0_12, %c0_13] : memref<128x64xf32, #tpu.memory_space<vmem>>, vector<128x64xf32>
    %cst_14 = arith.constant dense<0.000000e+00> : vector<64x64xf32>
    %16 = tpu.matmul %14, %15, %cst_14 {dimension_numbers = #tpu.dot_dimension_numbers<[1], [0], [0], [1], [0, 0, 1, 1], [], []>} : vector<64x128xf32>, vector<128x64xf32>, vector<64x64xf32> -> vector<64x64xf32>
    %c0_15 = arith.constant 0 : index
    %c0_16 = arith.constant 0 : index
    %17 = vector.load %arg7[%c0_15, %c0_16] : memref<1x64xf32, #tpu.memory_space<vmem>>, vector<1x64xf32>
    %18 = vector.broadcast %17 : vector<1x64xf32> to vector<64x64xf32>
    %19 = arith.addf %16, %18 : vector<64x64xf32>
    %cst_17 = arith.constant 0.000000e+00 : f32
    %20 = vector.broadcast %cst_17 : f32 to vector<64x64xf32>
    %21 = arith.maximumf %19, %20 : vector<64x64xf32>
    %c0_18 = arith.constant 0 : index
    %c0_19 = arith.constant 0 : index
    %22 = vector.load %arg8[%c0_18, %c0_19] : memref<64x128xf32, #tpu.memory_space<vmem>>, vector<64x128xf32>
    %cst_20 = arith.constant dense<0.000000e+00> : vector<64x128xf32>
    %23 = tpu.matmul %21, %22, %cst_20 {dimension_numbers = #tpu.dot_dimension_numbers<[1], [0], [0], [1], [0, 0, 1, 1], [], []>} : vector<64x64xf32>, vector<64x128xf32>, vector<64x128xf32> -> vector<64x128xf32>
    %c0_21 = arith.constant 0 : index
    %c0_22 = arith.constant 0 : index
    %24 = vector.load %arg9[%c0_21, %c0_22] : memref<1x128xf32, #tpu.memory_space<vmem>>, vector<1x128xf32>
    %25 = vector.broadcast %24 : vector<1x128xf32> to vector<64x128xf32>
    %26 = arith.addf %23, %25 : vector<64x128xf32>
    %c0_23 = arith.constant 0 : index
    %c0_24 = arith.constant 0 : index
    %27 = vector.load %arg10[%c0_23, %c0_24] : memref<64x128xf32, #tpu.memory_space<vmem>>, vector<64x128xf32>
    tpu.vector_store %arg10[%c0_23, %c0_24], %26 {strides = array<i32>} : memref<64x128xf32, #tpu.memory_space<vmem>>, vector<64x128xf32>,
    return
  }
  func.func @transform_0(%arg0: i32) -> (i32, i32) {
    %c0_i32 = arith.constant 0 : i32
    %c0_i32_0 = arith.constant 0 : i32
    return %arg0, %c0_i32 : i32, i32
  }
  func.func @transform_1(%arg0: i32) -> (i32, i32) {
    %c0_i32 = arith.constant 0 : i32
    %c0_i32_0 = arith.constant 0 : i32
    %c0_i32_1 = arith.constant 0 : i32
    return %c0_i32, %c0_i32_0 : i32, i32
  }
  func.func @transform_2(%arg0: i32) -> (i32, i32) {
    %c0_i32 = arith.constant 0 : i32
    %c0_i32_0 = arith.constant 0 : i32
    %c0_i32_1 = arith.constant 0 : i32
    return %c0_i32, %c0_i32_0 : i32, i32
  }
  func.func @transform_3(%arg0: i32) -> (i32, i32) {
    %c0_i32 = arith.constant 0 : i32
    %c0_i32_0 = arith.constant 0 : i32
    %c0_i32_1 = arith.constant 0 : i32
    return %c0_i32, %c0_i32_0 : i32, i32
  }
  func.func @transform_4(%arg0: i32) -> (i32, i32) {
    %c0_i32 = arith.constant 0 : i32
    %c0_i32_0 = arith.constant 0 : i32
    %c0_i32_1 = arith.constant 0 : i32
    return %c0_i32, %c0_i32_0 : i32, i32
  }
  func.func @transform_5(%arg0: i32) -> (i32, i32) {
    %c0_i32 = arith.constant 0 : i32
    %c0_i32_0 = arith.constant 0 : i32
    %c0_i32_1 = arith.constant 0 : i32
    return %c0_i32, %c0_i32_0 : i32, i32
  }
  func.func @transform_6(%arg0: i32) -> (i32, i32) {
    %c0_i32 = arith.constant 0 : i32
    %c0_i32_0 = arith.constant 0 : i32
    %c0_i32_1 = arith.constant 0 : i32
    return %c0_i32, %c0_i32_0 : i32, i32
  }
  func.func @transform_7(%arg0: i32) -> (i32, i32) {
    %c0_i32 = arith.constant 0 : i32
    %c0_i32_0 = arith.constant 0 : i32
    %c0_i32_1 = arith.constant 0 : i32
    return %c0_i32, %c0_i32_0 : i32, i32
  }
  func.func @transform_8(%arg0: i32) -> (i32, i32) {
    %c0_i32 = arith.constant 0 : i32
    %c0_i32_0 = arith.constant 0 : i32
    %c0_i32_1 = arith.constant 0 : i32
    return %c0_i32, %c0_i32_0 : i32, i32
  }
  func.func @transform_9(%arg0: i32) -> (i32, i32) {
    %c0_i32 = arith.constant 0 : i32
    %c0_i32_0 = arith.constant 0 : i32
    return %arg0, %c0_i32 : i32, i32
  }
}

</mosaic_0001>

<bundles_post_ra>
// kernel: tpu_custom_call.1
= control target key start
LH: loop header
LB: loop body
LE: loop exit
PB: predicated region body
PF: predicated region fallthrough
CT: control target
= control target key end

     0   :  { %vm49_vm0 = vcmask 64512   ;;  %s1123_s0 = inlined_call_operand.vmem [shape: f32[64,8], index: 0, kind: input, shape index: {}]   ;;  %s1124_s1 = inlined_call_operand.vmem [shape: f32[8,128], index: 1, kind: input, shape index: {}]   ;;  %s1125_s2 = inlined_call_operand.vmem [shape: f32[1,128], index: 2, kind: input, shape index: {}]   ;;  %s1126_s3 = inlined_call_operand.vmem [shape: f32[128,128], index: 3, kind: input, shape index: {}]   ;;  %s1127_s4 = inlined_call_operand.vmem [shape: f32[1,128], index: 4, kind: input, shape index: {}]   ;;  %s1128_s5 = inlined_call_operand.vmem [shape: f32[128,64], index: 5, kind: input, shape index: {}]   ;;  %s1129_s6 = inlined_call_operand.vmem [shape: f32[1,64], index: 6, kind: input, shape index: {}]   ;;  %s1130_s7 = inlined_call_operand.vmem [shape: f32[64,128], index: 7, kind: input, shape index: {}]   ;;  %s1131_s8 = inlined_call_operand.vmem [shape: f32[1,128], index: 8, kind: input, shape index: {}]   ;;  %s1132_s9 = inlined_call_operand.hbm [shape: f32[64,128], index: 9, kind: output, shape index: {}]  }
   0x1   :  { %v41_v0 = vld [vmem:[%s1124_s1] sm:$0xff]  ;;  %v34_v2 = vld [vmem:[%s1123_s0 + $0x8] sm:$0xff]  ;;  %v35_v3 = vld [vmem:[%s1123_s0 + $0x10] sm:$0xff] }
   0x2   :  { %v33_v1 = vld [vmem:[%s1123_s0] sm:$0xff]  ;;  %721 = vmatprep.subr.mxu0 %v41_v0  ;;  %v202_v4 = vld [vmem:[%s1126_s3 + $0x78] sm:$0xff]  ;;  %v201_v5 = vld [vmem:[%s1126_s3 + $0x70] sm:$0xff] }
   0x3   :  { %723 = vmatprep.mubr.msk.f32.mxu0 %vm49_vm0, %v33_v1  ;;  %722 = vmatpush3.msra.mxu0 %v41_v0  ;;  %v36_v6 = vld [vmem:[%s1123_s0 + $0x18] sm:$0xff]  ;;  %v37_v7 = vld [vmem:[%s1123_s0 + $0x20] sm:$0xff]  ;;  %v200_v8 = vld [vmem:[%s1126_s3 + $0x68] sm:$0xff] }
   0x4   :  { %724 = vmatmul.mubr.msk.f32.vlgmr.msra.gmra.mxu0 %vm49_vm0, %v34_v2  ;;  %735 = vmatprep.subr.mxu1 %v202_v4  ;;  %v199_v9 = vld [vmem:[%s1126_s3 + $0x60] sm:$0xff] }
   0x5   :  { %726 = vmatprep.mubr.msk.f32.mxu0 %vm49_vm0, %v35_v3  ;;  %736 = vmatpush3.msra.mxu1 %v202_v4 }
   0x6   :  { %737 = vmatprep.subr.mxu1 %v201_v5 }
   0x7   :  { %738 = vmatpush3.msra.mxu1 %v201_v5 }
   0x8   :  { %727 = vmatmul.mubr.msk.f32.gmra.mxu0 %vm49_vm0, %v36_v6 }
   0x9   :  { %14 = vsyncpa [#allocation3], 0  ;;  %729 = vmatprep.mubr.msk.f32.mxu0 %vm49_vm0, %v37_v7  ;;  %v38_v10 = vld [vmem:[%s1123_s0 + $0x28] sm:$0xff]  ;;  %739 = vmatprep.subr.mxu1 %v200_v8  ;;  %v39_v11 = vld [vmem:[%s1123_s0 + $0x30] sm:$0xff]  ;;  %vm474_vm1 = vcmask 523264   ;;  %s892_s16 = smov [#allocation2]  }
   0xa   :  { %740 = vmatpush3.msra.mxu1 %v200_v8  ;;  %v198_v12 = vld [vmem:[%s1126_s3 + $0x58] sm:$0xff]  ;;  %v197_v13 = vld [vmem:[%s1126_s3 + $0x50] sm:$0xff]  ;;  %v196_v15 = vld [vmem:[%s1126_s3 + $0x48] sm:$0xff]  ;;  %s617_s1 = sshll.u32 %s892_s16, 4  ;;  %s618_s1 = int_to_ptr.vmem [resolvable:$true] %s617_s1 }
   0xb   :  { %741 = vmatprep.subr.mxu1 %v199_v9  ;;  %v40_v14 = vld [vmem:[%s1123_s0 + $0x38] sm:$0xff]  ;;  %v195_v16 = vld [vmem:[%s1126_s3 + $0x40] sm:$0xff]  ;;  %v193_v18 = vld [vmem:[%s1126_s3 + $0x30] sm:$0xff]  ;;  %p875_p1 = scmp.lt.s32.totalorder %s618_s1, %s618_s1 }
   0xc   :  { %730 = vmatmul.mubr.msk.f32.gmra.mxu0 %vm49_vm0, %v38_v10  ;;  %742 = vmatpush3.msra.mxu1 %v199_v9  ;;  %v194_v17 = vld [vmem:[%s1126_s3 + $0x38] sm:$0xff]  ;;  %v192_v19 = vld [vmem:[%s1126_s3 + $0x28] sm:$0xff]  ;;  %v191_v20 = vld [vmem:[%s1126_s3 + $0x20] sm:$0xff] }
   0xd   :  { %732 = vmatprep.mubr.msk.f32.mxu0 %vm49_vm0, %v39_v11  ;;  %743 = vmatprep.subr.mxu1 %v198_v12  ;;  %v190_v21 = vld [vmem:[%s1126_s3 + $0x18] sm:$0xff]  ;;  %v189_v22 = vld [vmem:[%s1126_s3 + $0x10] sm:$0xff]  ;;  %v188_v23 = vld [vmem:[%s1126_s3 + $0x8] sm:$0xff] }
   0xe   :  { %744 = vmatpush3.msra.mxu1 %v198_v12  ;;  %v187_v24 = vld [vmem:[%s1126_s3] sm:$0xff]  ;;  %v338_v25 = vld [vmem:[%s1128_s5 + $0x78] sm:$0xff]  ;;  %v337_v26 = vld [vmem:[%s1128_s5 + $0x70] sm:$0xff] }
   0xf   :  { %745 = vmatprep.subr.mxu1 %v197_v13  ;;  %779 = vmatprep.subr.mxu0 %v338_v25  ;;  %v336_v27 = vld [vmem:[%s1128_s5 + $0x68] sm:$0xff]  ;;  %v335_v28 = vld [vmem:[%s1128_s5 + $0x60] sm:$0xff]  ;;  %v334_v29 = vld [vmem:[%s1128_s5 + $0x58] sm:$0xff] }
  0x10   :  { %733 = vmatmul.mubr.msk.f32.gmra.mxu0 %vm49_vm0, %v40_v14  ;;  %746 = vmatpush3.msra.mxu1 %v197_v13  ;;  %v333_v30 = vld [vmem:[%s1128_s5 + $0x50] sm:$0xff]  ;;  %v332_v31 = vld [vmem:[%s1128_s5 + $0x48] sm:$0xff]  ;;  %v331_v32 = vld [vmem:[%s1128_s5 + $0x40] sm:$0xff] }
  0x11   :  { %747 = vmatprep.subr.mxu1 %v196_v15  ;;  %780 = vmatpush3.msra.mxu0 %v338_v25  ;;  %v330_v33 = vld [vmem:[%s1128_s5 + $0x38] sm:$0xff]  ;;  %v329_v34 = vld [vmem:[%s1128_s5 + $0x30] sm:$0xff]  ;;  %v328_v35 = vld [vmem:[%s1128_s5 + $0x28] sm:$0xff] }
  0x12   :  { %748 = vmatpush3.msra.mxu1 %v196_v15  ;;  %781 = vmatprep.subr.mxu0 %v337_v26  ;;  %v327_v36 = vld [vmem:[%s1128_s5 + $0x20] sm:$0xff]  ;;  %v326_v62 = vld [vmem:[%s1128_s5 + $0x18] sm:$0xff]  ;;  %v325_v63 = vld [vmem:[%s1128_s5 + $0x10] sm:$0xff] }
  0x13   :  { %749 = vmatprep.subr.mxu1 %v195_v16  ;;  %782 = vmatpush3.msra.mxu0 %v337_v26  ;;  %v628_v37 = vld [vmem:[%s1125_s2] ss:$0 sm:$0xff]  ;;  %v324_v0 = vld [vmem:[%s1128_s5 + $0x8] sm:$0xff]  ;;  %v466_v2 = vld [vmem:[%s1130_s7 + $0x38] sm:$0xff] }
  0x14   :  { %750 = vmatpush3.msra.mxu1 %v195_v16  ;;  %783 = vmatprep.subr.mxu0 %v336_v27  ;;  %v323_v1 = vld [vmem:[%s1128_s5] sm:$0xff]  ;;  %v465_v3 = vld [vmem:[%s1130_s7 + $0x30] sm:$0xff]  ;;  %v464_v4 = vld [vmem:[%s1130_s7 + $0x28] sm:$0xff] }
  0x15   :  { %751 = vmatprep.subr.mxu1 %v194_v17  ;;  %784 = vmatpush3.msra.mxu0 %v336_v27  ;;  %v463_v5 = vld [vmem:[%s1130_s7 + $0x20] sm:$0xff] }
  0x16   :  { %752 = vmatpush3.msra.mxu1 %v194_v17  ;;  %785 = vmatprep.subr.mxu0 %v335_v28  ;;  %v637_v6 = vld [vmem:[%s1127_s4] ss:$0 sm:$0xff] }
  0x17   :  { %753 = vmatprep.subr.mxu1 %v193_v18  ;;  %786 = vmatpush3.msra.mxu0 %v335_v28 }
  0x18   :  { %754 = vmatpush3.msra.mxu1 %v193_v18  ;;  %787 = vmatprep.subr.mxu0 %v334_v29 }
  0x19   :  { %755 = vmatprep.subr.mxu1 %v192_v19  ;;  %788 = vmatpush3.msra.mxu0 %v334_v29 }
  0x1a   :  { %756 = vmatpush3.msra.mxu1 %v192_v19  ;;  %789 = vmatprep.subr.mxu0 %v333_v30 }
  0x1b   :  { %757 = vmatprep.subr.mxu1 %v191_v20  ;;  %790 = vmatpush3.msra.mxu0 %v333_v30 }
  0x1c   :  { %758 = vmatpush3.msra.mxu1 %v191_v20  ;;  %791 = vmatprep.subr.mxu0 %v332_v31 }
  0x1d   :  { %759 = vmatprep.subr.mxu1 %v190_v21  ;;  %792 = vmatpush3.msra.mxu0 %v332_v31  ;;  %v462_v31 = vld [vmem:[%s1130_s7 + $0x18] sm:$0xff] }
  0x1e   :  { %760 = vmatpush3.msra.mxu1 %v190_v21  ;;  %793 = vmatprep.subr.mxu0 %v331_v32 }
  0x1f   :  { %761 = vmatprep.subr.mxu1 %v189_v22  ;;  %794 = vmatpush3.msra.mxu0 %v331_v32  ;;  %v461_v32 = vld [vmem:[%s1130_s7 + $0x10] sm:$0xff] }
  0x20   :  { %762 = vmatpush3.msra.mxu1 %v189_v22  ;;  %795 = vmatprep.subr.mxu0 %v330_v33 }
  0x21   :  { %763 = vmatprep.subr.mxu1 %v188_v23  ;;  %796 = vmatpush3.msra.mxu0 %v330_v33  ;;  %v460_v33 = vld [vmem:[%s1130_s7 + $0x8] sm:$0xff] }
  0x22   :  { %764 = vmatpush3.msra.mxu1 %v188_v23  ;;  %797 = vmatprep.subr.mxu0 %v329_v34 }
  0x23   :  { %765 = vmatprep.subr.mxu1 %v187_v24  ;;  %798 = vmatpush3.msra.mxu0 %v329_v34  ;;  %v459_v34 = vld [vmem:[%s1130_s7] sm:$0xff] }
  0x24   :  { %766 = vmatpush3.msra.mxu1 %v187_v24  ;;  %799 = vmatprep.subr.mxu0 %v328_v35 }
  0x25   :  { %800 = vmatpush3.msra.mxu0 %v328_v35  ;;  %851 = vmatprep.subr.mxu1 %v466_v2  ;;  %v638_v35 = vld [vmem:[%s1129_s6] ss:$0 sm:$0xff] }
  0x26   :  { %801 = vmatprep.subr.mxu0 %v327_v36 }
  0x27   :  { %802 = vmatpush3.msra.mxu0 %v327_v36 }
  0x28   :  { %803 = vmatprep.subr.mxu0 %v326_v62 }
  0x29   :  { %804 = vmatpush3.msra.mxu0 %v326_v62 }
  0x2a   :  { %805 = vmatprep.subr.mxu0 %v325_v63 }
  0x2b   :  { %806 = vmatpush3.msra.mxu0 %v325_v63 }
  0x2c   :  { %807 = vmatprep.subr.mxu0 %v324_v0 }
  0x2d   :  { %808 = vmatpush3.msra.mxu0 %v324_v0 }
  0x2e   :  { %809 = vmatprep.subr.mxu0 %v323_v1 }
  0x2f   :  { %810 = vmatpush3.msra.mxu0 %v323_v1 }
  0x30   :  { %823 = vmatprep.subr.mxu0 %v466_v2 }
  0xc4   :  { %v725_v38 = vpop.f32.mrf.mxu0 }
  0xc5   :  { %v146_v39 = vadd.f32 %v725_v38, %v628_v37 }
  0xc6   :  { %v140_v40 = vpop.f32.mrf.mxu0 }
  0xc7   :  { %v141_v41 = vadd.f32 %v628_v37, %v140_v40  ;;  %v180_v44 = vmax.f32 %v146_v39, 0.0 }
  0xc8   :  { %v728_v42 = vpop.f32.mrf.mxu0 }
  0xc9   :  { %v179_v43 = vmax.f32 %v141_v41, 0.0  ;;  %v156_v45 = vadd.f32 %v728_v42, %v628_v37 }
  0xca   :  { %v150_v46 = vpop.f32.mrf.mxu0 }
  0xcb   :  { %v151_v47 = vadd.f32 %v628_v37, %v150_v46  ;;  %767 = vmatprep.mubr.f32.mxu1 %v179_v43  ;;  %v182_v50 = vmax.f32 %v156_v45, 0.0 }
  0xcc   :  { %v731_v48 = vpop.f32.mrf.mxu0  ;;  %768 = vmatmul.mubr.f32.vlgmr.msra.gmra.mxu1 %v180_v44 }
  0xcd   :  { %v181_v49 = vmax.f32 %v151_v47, 0.0  ;;  %v166_v51 = vadd.f32 %v731_v48, %v628_v37  ;;  %859 = vmatpush3.msra.mxu1 %v466_v2 }
  0xce   :  { %v160_v52 = vpop.f32.mrf.mxu0  ;;  %852 = vmatprep.subr.mxu1 %v465_v3 }
  0xcf   :  { %v161_v53 = vadd.f32 %v628_v37, %v160_v52  ;;  %770 = vmatprep.mubr.f32.mxu1 %v181_v49  ;;  %v184_v56 = vmax.f32 %v166_v51, 0.0  ;;  %860 = vmatpush3.msra.mxu1 %v465_v3 }
  0xd0   :  { %v734_v54 = vpop.f32.mrf.mxu0  ;;  %771 = vmatmul.mubr.f32.gmra.mxu1 %v182_v50  ;;  %853 = vmatprep.subr.mxu1 %v464_v4 }
  0xd1   :  { %v183_v55 = vmax.f32 %v161_v53, 0.0  ;;  %v176_v57 = vadd.f32 %v734_v54, %v628_v37  ;;  %861 = vmatpush3.msra.mxu1 %v464_v4 }
  0xd2   :  { %v170_v58 = vpop.f32.mrf.mxu0  ;;  %854 = vmatprep.subr.mxu1 %v463_v5 }
  0xd3   :  { %v171_v59 = vadd.f32 %v628_v37, %v170_v58  ;;  %773 = vmatprep.mubr.f32.mxu1 %v183_v55  ;;  %v186_v61 = vmax.f32 %v176_v57, 0.0  ;;  %862 = vmatpush3.msra.mxu1 %v463_v5 }
  0xd4   :  { %774 = vmatmul.mubr.f32.gmra.mxu1 %v184_v56  ;;  %855 = vmatprep.subr.mxu1 %v462_v31 }
  0xd5   :  { %v185_v60 = vmax.f32 %v171_v59, 0.0  ;;  %863 = vmatpush3.msra.mxu1 %v462_v31 }
  0xd6   :  { %856 = vmatprep.subr.mxu1 %v461_v32 }
  0xd7   :  { %776 = vmatprep.mubr.f32.mxu1 %v185_v60  ;;  %864 = vmatpush3.msra.mxu1 %v461_v32  ;;  %v639_v60 = vld [vmem:[%s1131_s8] ss:$0 sm:$0xff]  ;;  %s870_s8 = scalar_lea.vmem %s618_s1, 1024 }
  0xd8   :  { %777 = vmatmul.mubr.f32.gmra.mxu1 %v186_v61  ;;  %857 = vmatprep.subr.mxu1 %v460_v33  ;;  %p871_p0 = scmp.ne.s32.totalorder %s618_s1, %s870_s8  ;;  %p876_p2 = scmp.lt.s32.totalorder %s870_s8, %s870_s8 }
  0xd9   :  { %865 = vmatpush3.msra.mxu1 %v460_v33 }
  0xda   :  { %858 = vmatprep.subr.mxu1 %v459_v34  ;;  %p877_p3 = por %p876_p2, %p875_p1 }
  0xdb   :  { %866 = vmatpush3.msra.mxu1 %v459_v34 }
  0xdc   :  { %p878_p4 = pnand %p877_p3, %p871_p0 }
 0x18c   :  { %v769_v7 = vpop.f32.mrf.mxu1 }
 0x18d   :  { %v282_v8 = vadd.f32 %v769_v7, %v637_v6 }
 0x18e   :  { %v276_v9 = vpop.f32.mrf.mxu1 }
 0x18f   :  { %v277_v10 = vadd.f32 %v637_v6, %v276_v9  ;;  %v316_v13 = vmax.f32 %v282_v8, 0.0 }
 0x190   :  { %v772_v11 = vpop.f32.mrf.mxu1 }
 0x191   :  { %v315_v12 = vmax.f32 %v277_v10, 0.0  ;;  %v292_v14 = vadd.f32 %v772_v11, %v637_v6 }
 0x192   :  { %v286_v15 = vpop.f32.mrf.mxu1 }
 0x193   :  { %v287_v16 = vadd.f32 %v637_v6, %v286_v15  ;;  %811 = vmatprep.mubr.f32.mxu0 %v315_v12  ;;  %v318_v19 = vmax.f32 %v292_v14, 0.0 }
 0x194   :  { %v775_v17 = vpop.f32.mrf.mxu1  ;;  %812 = vmatmul.mubr.f32.vlgmr.msra.gmra.mxu0 %v316_v13 }
 0x195   :  { %v317_v18 = vmax.f32 %v287_v16, 0.0  ;;  %824 = vmatpush3.msra.mxu0 %v466_v2  ;;  %v302_v20 = vadd.f32 %v775_v17, %v637_v6 }
 0x196   :  { %v296_v21 = vpop.f32.mrf.mxu1  ;;  %825 = vmatprep.subr.mxu0 %v465_v3 }
 0x197   :  { %v297_v22 = vadd.f32 %v637_v6, %v296_v21  ;;  %814 = vmatprep.mubr.f32.mxu0 %v317_v18  ;;  %826 = vmatpush3.msra.mxu0 %v465_v3  ;;  %v320_v25 = vmax.f32 %v302_v20, 0.0 }
 0x198   :  { %v778_v23 = vpop.f32.mrf.mxu1  ;;  %815 = vmatmul.mubr.f32.gmra.mxu0 %v318_v19  ;;  %827 = vmatprep.subr.mxu0 %v464_v4 }
 0x199   :  { %v319_v24 = vmax.f32 %v297_v22, 0.0  ;;  %828 = vmatpush3.msra.mxu0 %v464_v4  ;;  %v312_v26 = vadd.f32 %v778_v23, %v637_v6 }
 0x19a   :  { %v306_v27 = vpop.f32.mrf.mxu1  ;;  %829 = vmatprep.subr.mxu0 %v463_v5 }
 0x19b   :  { %v307_v28 = vadd.f32 %v637_v6, %v306_v27  ;;  %817 = vmatprep.mubr.f32.mxu0 %v319_v24  ;;  %830 = vmatpush3.msra.mxu0 %v463_v5  ;;  %v322_v30 = vmax.f32 %v312_v26, 0.0 }
 0x19c   :  { %818 = vmatmul.mubr.f32.gmra.mxu0 %v320_v25  ;;  %831 = vmatprep.subr.mxu0 %v462_v31 }
 0x19d   :  { %v321_v29 = vmax.f32 %v307_v28, 0.0  ;;  %832 = vmatpush3.msra.mxu0 %v462_v31 }
 0x19e   :  { %833 = vmatprep.subr.mxu0 %v461_v32 }
 0x19f   :  { %820 = vmatprep.mubr.f32.mxu0 %v321_v29  ;;  %834 = vmatpush3.msra.mxu0 %v461_v32 }
 0x1a0   :  { %821 = vmatmul.mubr.f32.gmra.mxu0 %v322_v30  ;;  %835 = vmatprep.subr.mxu0 %v460_v33 }
 0x1a1   :  { %836 = vmatpush3.msra.mxu0 %v460_v33 }
 0x1a2   :  { %837 = vmatprep.subr.mxu0 %v459_v34 }
 0x1a3   :  { %838 = vmatpush3.msra.mxu0 %v459_v34 }
 0x254   :  { %v813_v36 = vpop.f32.mrf.mxu0 }
 0x255   :  { %v418_v37 = vadd.f32 %v813_v36, %v638_v35 }
 0x256   :  { %v412_v38 = vpop.f32.mrf.mxu0 }
 0x257   :  { %v413_v39 = vadd.f32 %v638_v35, %v412_v38  ;;  %v452_v42 = vmax.f32 %v418_v37, 0.0 }
 0x258   :  { %v816_v40 = vpop.f32.mrf.mxu0 }
 0x259   :  { %v451_v41 = vmax.f32 %v413_v39, 0.0  ;;  %v428_v43 = vadd.f32 %v816_v40, %v638_v35 }
 0x25a   :  { %v422_v44 = vpop.f32.mrf.mxu0 }
 0x25b   :  { %v423_v45 = vadd.f32 %v638_v35, %v422_v44  ;;  %839 = vmatprep.mubr.msk.f32.mxu0 %vm474_vm1, %v451_v41  ;;  %v454_v48 = vmax.f32 %v428_v43, 0.0 }
 0x25c   :  { %v819_v46 = vpop.f32.mrf.mxu0  ;;  %840 = vmatmul.mubr.msk.f32.vlgmr.msra.gmra.mxu0 %vm474_vm1, %v452_v42 }
 0x25d   :  { %v453_v47 = vmax.f32 %v423_v45, 0.0  ;;  %v438_v49 = vadd.f32 %v819_v46, %v638_v35 }
 0x25e   :  { %v432_v50 = vpop.f32.mrf.mxu0 }
 0x25f   :  { %v433_v51 = vadd.f32 %v638_v35, %v432_v50  ;;  %842 = vmatprep.mubr.msk.f32.mxu1 %vm474_vm1, %v453_v47  ;;  %v456_v54 = vmax.f32 %v438_v49, 0.0 }
 0x260   :  { %v822_v52 = vpop.f32.mrf.mxu0  ;;  %843 = vmatmul.mubr.msk.f32.vlgmr.msra.gmra.mxu1 %vm474_vm1, %v454_v48 }
 0x261   :  { %v455_v53 = vmax.f32 %v433_v51, 0.0  ;;  %v448_v55 = vadd.f32 %v822_v52, %v638_v35 }
 0x262   :  { %v442_v56 = vpop.f32.mrf.mxu0 }
 0x263   :  { %v443_v57 = vadd.f32 %v638_v35, %v442_v56  ;;  %845 = vmatprep.mubr.msk.f32.mxu1 %vm474_vm1, %v455_v53  ;;  %v458_v59 = vmax.f32 %v448_v55, 0.0 }
 0x264   :  { %846 = vmatmul.mubr.msk.f32.gmra.mxu1 %vm474_vm1, %v456_v54 }
 0x265   :  { %v457_v58 = vmax.f32 %v443_v57, 0.0 }
 0x267   :  { %848 = vmatprep.mubr.msk.f32.mxu1 %vm474_vm1, %v457_v58 }
 0x268   :  { %849 = vmatmul.mubr.msk.f32.gmra.mxu1 %vm474_vm1, %v458_v59 }
 0x31c   :  { %v841_v61 = vpop.f32.mrf.mxu0 }
 0x31d   :  { %v571_v62 = vadd.f32 %v841_v61, %v639_v60 }
 0x31e   :  { %v565_v63 = vpop.f32.mrf.mxu0 }
 0x31f   :  { %605 = vst [vmem:[#allocation2 + $0x8] sm:$0xff] %v571_v62  ;;  %v566_v0 = vadd.f32 %v639_v60, %v565_v63 }
 0x320   :  { %v844_v1 = vpop.f32.mrf.mxu1 }
 0x321   :  { %604 = vst [vmem:[#allocation2] sm:$0xff] %v566_v0  ;;  %v581_v2 = vadd.f32 %v844_v1, %v639_v60 }
 0x322   :  { %v575_v3 = vpop.f32.mrf.mxu1 }
 0x323   :  { %607 = vst [vmem:[#allocation2 + $0x18] sm:$0xff] %v581_v2  ;;  %v576_v4 = vadd.f32 %v639_v60, %v575_v3 }
 0x324   :  { %v847_v5 = vpop.f32.mrf.mxu1 }
 0x325   :  { %606 = vst [vmem:[#allocation2 + $0x10] sm:$0xff] %v576_v4  ;;  %v591_v6 = vadd.f32 %v847_v5, %v639_v60 }
 0x326   :  { %v585_v7 = vpop.f32.mrf.mxu1 }
 0x327   :  { %609 = vst [vmem:[#allocation2 + $0x28] sm:$0xff] %v591_v6  ;;  %v586_v8 = vadd.f32 %v639_v60, %v585_v7 }
 0x328   :  { %v850_v9 = vpop.f32.mrf.mxu1 }
 0x329   :  { %608 = vst [vmem:[#allocation2 + $0x20] sm:$0xff] %v586_v8  ;;  %v601_v10 = vadd.f32 %v850_v9, %v639_v60 }
 0x32a   :  { %v595_v11 = vpop.f32.mrf.mxu1 }
 0x32b   :  { %611 = vst [vmem:[#allocation2 + $0x38] sm:$0xff] %v601_v10  ;;  %v596_v12 = vadd.f32 %v639_v60, %v595_v11 }
 0x32d   :  { %610 = vst [vmem:[#allocation2 + $0x30] sm:$0xff] %v596_v12 }
 0x32e   :  { %881 = shalt.err (!%p878_p4)
}
 0x32f   :  { %s893_s17 = smov 128   ;;  %s894_s18 = smov 8  }
 0x330   :  { %623 = dma.vmem_to_hbm [thread:$0]  %s618_s1, 1024, %s1132_s9, [#allocation3], %s893_s17, %s893_s17, %s894_s18  }
 0x331   :  { %890 = dma.done.wait [#allocation3], 1024  }
 0x332   :  { %891 = vsyncadd [#allocation3], 4294966272 }
 0x333   :  { %627 = vsyncpa [#allocation3], 1 }

</bundles_post_ra>
